<compile_context>
chip_gen: v6e
topology: v6e:2x2x1
jax: 0.10.0
libtpu: 0.0.40
codegen_flags: <defaults>
</compile_context>

<pallas_src>
import math
from functools import partial

import jax
import jax.numpy as jnp
from jax.experimental import pallas as pl
from jax.experimental.pallas import tpu as pltpu


# ------------------------------- kernel ------------------------------------


def _ffn_kernel(x_ref, w1_ref, b1_ref, w2_ref, b2_ref, o_ref, acc_ref):
    # x_ref:  (TM, Dm)   input row tile
    # w1_ref: (Dm, TF)   column slice of W1^T  (pre-transposed in wrapper)
    # b1_ref: (1, TF)    f32
    # w2_ref: (TF, Dm)   row slice of W2^T     (pre-transposed in wrapper)
    # b2_ref: (1, Dm)    f32
    # o_ref:  (TM, Dm)
    # acc_ref:(TM, Dm)   f32, resident across the d_ff grid axis.
    j = pl.program_id(1)

    # h_tile = relu(x @ W1t_tile + b1_tile)        -> (TM, TF), f32
    h = jnp.dot(x_ref[...], w1_ref[...], preferred_element_type=jnp.float32)
    h = jnp.maximum(h + b1_ref[...], 0.0)

    # partial = h_tile @ W2t_tile                  -> (TM, Dm), f32
    part = jnp.dot(h.astype(w2_ref.dtype), w2_ref[...],
                   preferred_element_type=jnp.float32)

    @pl.when(j == 0)
    def _():
        acc_ref[...] = part          # skip zero-init + RMW on the first step

    @pl.when(j > 0)
    def _():
        acc_ref[...] += part

    @pl.when(j == pl.num_programs(1) - 1)
    def _():
        o_ref[...] = (acc_ref[...] + b2_ref[...]).astype(o_ref.dtype)


# --------------------------- tiling heuristics ------------------------------


def _round_up(x, m):
    return ((x + m - 1) // m) * m


def _sublane_multiple(itemsize):
    # f32 -> 8 rows, bf16 -> 16, int8/fp8 -> 32 (sub-32-bit packs along sublanes)
    return max(8, 32 // max(1, itemsize))


def _vmem_budget():
    cap = 64 * 1024 * 1024          # conservative fallback (v7x per-core VMEM)
    try:
        info = pltpu.get_tpu_info()
        got = int(getattr(info, "vmem_capacity_bytes", 0) or 0)
        if got > 0:
            cap = got
    except Exception:
        pass
    budget = int(cap * 0.70)        # tile-sizing budget
    limit = int(cap * 0.90)         # scoped-VMEM limit handed to Mosaic
    return budget, limit


def _pick_tiles(M, d_model, d_ff, comp_itemsize, out_itemsize, budget):
    """Lane-aligned tile sizes under a generation-aware VMEM budget."""
    Dm = _round_up(d_model, 128)
    Dff = _round_up(d_ff, 128)
    sub = _sublane_multiple(min(comp_itemsize, out_itemsize))
    M_al = _round_up(M, sub)

    def need(tm, tf):
        # double-buffered in/out tiles + f32 accumulator scratch
        # (1-row bias tiles occupy >= 8 sublanes in VMEM layout)
        return (2 * comp_itemsize * (tm * Dm + Dm * tf + 8 * tf + tf * Dm + 8 * Dm)
                + 2 * out_itemsize * tm * Dm
                + 4 * tm * Dm)

    # TM: as large as the budget allows (HBM reuse of weights), but keep at
    # least 2 M tiles when rows permit so the "parallel" axis feeds 2 cores.
    tm_cap = 1024
    if M_al > sub:
        tm_cap = min(tm_cap, max(sub, _round_up((M_al + 1) // 2, sub)))
    tm_max = min(tm_cap, M_al)

    # ---- fast path: weights fully resident (TF = padded d_ff) ----
    tm_floor = min(128, tm_max)
    tm = tm_max
    while tm > tm_floor and need(tm, Dff) > budget:
        tm = max(tm_floor, _round_up(tm // 2, sub))
    if need(tm, Dff) <= budget:
        return tm, Dff, Dm

    # ---- fallback: stream weight tiles along a d_ff reduction axis ----
    tm, tf = tm_max, min(512, Dff)
    while need(tm, tf) > budget:
        if tf > 128:
            tf = max(128, _round_up(tf // 2, 128))
        elif tm > sub:
            tm = max(sub, _round_up(tm // 2, sub))
        else:
            # TODO(synk): for very wide d_model also tile Dm (output N) on a
            # third grid axis; not needed for typical transformer FFN sizes.
            break
    return tm, tf, Dm


# ------------------------------- wrapper ------------------------------------


@partial(jax.jit, static_argnames=("compute_dtype",))
def feed_forward(x, w1, b1, w2, b2, *, compute_dtype=None):
    """x: (B, S, d_model); w1: (d_ff, d_model), b1: (d_ff,);
    w2: (d_model, d_ff), b2: (d_model,)  -- PyTorch nn.Linear conventions.
    compute_dtype: optional matmul dtype (e.g. jnp.bfloat16); f32 accumulate."""
    B, S, d_model = x.shape
    d_ff = w1.shape[0]
    M = B * S
    out_dtype = x.dtype
    comp = jnp.dtype(compute_dtype) if compute_dtype is not None else jnp.dtype(x.dtype)

    budget, vmem_limit = _vmem_budget()
    TM, TF, Dm = _pick_tiles(M, d_model, d_ff, comp.itemsize,
                             jnp.dtype(out_dtype).itemsize, budget)
    Mp = _round_up(M, TM)
    Dff_p = _round_up(d_ff, TF)

    # ---- one-time transpose + zero-pad to aligned shapes (no-ops if aligned) ----
    x2d = x.reshape(M, d_model).astype(comp)
    if (Mp, Dm) != (M, d_model):
        x2d = jnp.pad(x2d, ((0, Mp - M), (0, Dm - d_model)))

    w1t = w1.T.astype(comp)                     # (d_model, d_ff)
    if (Dm, Dff_p) != (d_model, d_ff):
        w1t = jnp.pad(w1t, ((0, Dm - d_model), (0, Dff_p - d_ff)))

    w2t = w2.T.astype(comp)                     # (d_ff, d_model)
    if (Dff_p, Dm) != (d_ff, d_model):
        w2t = jnp.pad(w2t, ((0, Dff_p - d_ff), (0, Dm - d_model)))

    b1p = b1.astype(jnp.float32)
    if Dff_p != d_ff:
        b1p = jnp.pad(b1p, (0, Dff_p - d_ff))
    b1p = b1p.reshape(1, Dff_p)

    b2p = b2.astype(jnp.float32)
    if Dm != d_model:
        b2p = jnp.pad(b2p, (0, Dm - d_model))
    b2p = b2p.reshape(1, Dm)

    grid = (Mp // TM, Dff_p // TF)

    cost = pl.CostEstimate(
        flops=4 * M * d_model * d_ff,
        transcendentals=0,
        bytes_accessed=(M * d_model * (comp.itemsize + jnp.dtype(out_dtype).itemsize)
                        + 2 * d_model * d_ff * comp.itemsize
                        + (d_ff + d_model) * 4),
    )

    out2d = pl.pallas_call(
        _ffn_kernel,
        out_shape=jax.ShapeDtypeStruct((Mp, Dm), out_dtype),
        grid=grid,
        in_specs=[
            pl.BlockSpec((TM, Dm), lambda i, j: (i, 0)),    # x row tile
            pl.BlockSpec((Dm, TF), lambda i, j: (0, j)),    # W1^T col tile
            pl.BlockSpec((1, TF), lambda i, j: (0, j)),     # b1 tile
            pl.BlockSpec((TF, Dm), lambda i, j: (j, 0)),    # W2^T row tile
            pl.BlockSpec((1, Dm), lambda i, j: (0, 0)),     # b2 (resident)
        ],
        out_specs=pl.BlockSpec((TM, Dm), lambda i, j: (i, 0)),
        scratch_shapes=[pltpu.VMEM((TM, Dm), jnp.float32)],
        compiler_params=pltpu.CompilerParams(
            dimension_semantics=("parallel", "arbitrary"),
            vmem_limit_bytes=vmem_limit,
        ),
        cost_estimate=cost,
    )(x2d, w1t, b1p, w2t, b2p)

    return out2d[:M, :d_model].reshape(B, S, d_model)


# --------------------------------- test -------------------------------------


if __name__ == "__main__":
    # Small shapes: batch=2, seq=8, d_model=32, d_ff=64
    B, S, d_model, d_ff = 2, 8, 32, 64
    key = jax.random.PRNGKey(0)
    kx, kw1, kb1, kw2, kb2 = jax.random.split(key, 5)

    x = jax.random.normal(kx, (B, S, d_model), dtype=jnp.float32)
    # Deterministic init (mimic nn.Linear uniform(-1/sqrt(fan_in), +1/sqrt(fan_in)))
    lim1 = 1.0 / math.sqrt(d_model)
    lim2 = 1.0 / math.sqrt(d_ff)
    w1 = jax.random.uniform(kw1, (d_ff, d_model), minval=-lim1, maxval=lim1)
    b1 = jax.random.uniform(kb1, (d_ff,), minval=-lim1, maxval=lim1)
    w2 = jax.random.uniform(kw2, (d_model, d_ff), minval=-lim2, maxval=lim2)
    b2 = jax.random.uniform(kb2, (d_model,), minval=-lim2, maxval=lim2)

    # Reference in plain JAX
    ref = jnp.maximum(x @ w1.T + b1, 0.0) @ w2.T + b2

    # f32 compute path: exact-ish match
    out = feed_forward(x, w1, b1, w2, b2)
    jax.block_until_ready(out)
    assert out.shape == (B, S, d_model)
    assert jnp.allclose(out, ref, atol=1e-5, rtol=1e-5)

    # bf16 compute path (half weight-DMA bytes, full MXU rate): looser tolerance
    out_bf16 = feed_forward(x, w1, b1, w2, b2, compute_dtype=jnp.bfloat16)
    jax.block_until_ready(out_bf16)
    assert out_bf16.shape == (B, S, d_model)
    assert jnp.allclose(out_bf16, ref, atol=5e-2, rtol=5e-2)

    print("KERNEL_OK")
</pallas_src>

<mosaic_0001>
module attributes {stable_mosaic.version = 11 : i64} {
  func.func @_ffn_kernel(%arg0: i32, %arg1: i32, %arg2: memref<8x128xf32, #tpu.memory_space<vmem>>, %arg3: memref<128x128xf32, #tpu.memory_space<vmem>>, %arg4: memref<1x128xf32, #tpu.memory_space<vmem>>, %arg5: memref<128x128xf32, #tpu.memory_space<vmem>>, %arg6: memref<1x128xf32, #tpu.memory_space<vmem>>, %arg7: memref<8x128xf32, #tpu.memory_space<vmem>>, %arg8: memref<8x128xf32, #tpu.memory_space<vmem>>) attributes {dimension_semantics = [#tpu.dimension_semantics<parallel>, #tpu.dimension_semantics<arbitrary>], iteration_bounds = array<i64: 2, 1>, scalar_prefetch = 0 : i64, scratch_operands = 1 : i64, tpu.core_type = #tpu.core_type<tc>, window_params = [{transform_indices = @transform_0, window_bounds = array<i64: 8, 128>}, {transform_indices = @transform_1, window_bounds = array<i64: 128, 128>}, {transform_indices = @transform_2, window_bounds = array<i64: 1, 128>}, {transform_indices = @transform_3, window_bounds = array<i64: 128, 128>}, {pipeline_mode = #tpu.pipeline_mode<synchronous>, transform_indices = @transform_4, window_bounds = array<i64: 1, 128>}, {transform_indices = @transform_5, window_bounds = array<i64: 8, 128>}]} {
    %c0 = arith.constant 0 : index
    %c0_0 = arith.constant 0 : index
    %0 = vector.load %arg2[%c0, %c0_0] : memref<8x128xf32, #tpu.memory_space<vmem>>, vector<8x128xf32>
    %c0_1 = arith.constant 0 : index
    %c0_2 = arith.constant 0 : index
    %1 = vector.load %arg3[%c0_1, %c0_2] : memref<128x128xf32, #tpu.memory_space<vmem>>, vector<128x128xf32>
    %cst = arith.constant dense<0.000000e+00> : vector<8x128xf32>
    %2 = tpu.matmul %0, %1, %cst {dimension_numbers = #tpu.dot_dimension_numbers<[1], [0], [0], [1], [0, 0, 1, 1], [], []>} : vector<8x128xf32>, vector<128x128xf32>, vector<8x128xf32> -> vector<8x128xf32>
    %c0_3 = arith.constant 0 : index
    %c0_4 = arith.constant 0 : index
    %3 = vector.load %arg4[%c0_3, %c0_4] : memref<1x128xf32, #tpu.memory_space<vmem>>, vector<1x128xf32>
    %4 = vector.broadcast %3 : vector<1x128xf32> to vector<8x128xf32>
    %5 = arith.addf %2, %4 : vector<8x128xf32>
    %cst_5 = arith.constant 0.000000e+00 : f32
    %6 = vector.broadcast %cst_5 : f32 to vector<8x128xf32>
    %7 = arith.maximumf %5, %6 : vector<8x128xf32>
    %c0_6 = arith.constant 0 : index
    %c0_7 = arith.constant 0 : index
    %8 = vector.load %arg5[%c0_6, %c0_7] : memref<128x128xf32, #tpu.memory_space<vmem>>, vector<128x128xf32>
    %cst_8 = arith.constant dense<0.000000e+00> : vector<8x128xf32>
    %9 = tpu.matmul %7, %8, %cst_8 {dimension_numbers = #tpu.dot_dimension_numbers<[1], [0], [0], [1], [0, 0, 1, 1], [], []>} : vector<8x128xf32>, vector<128x128xf32>, vector<8x128xf32> -> vector<8x128xf32>
    %c0_i32 = arith.constant 0 : i32
    %10 = arith.cmpi eq, %arg1, %c0_i32 : i32
    %11 = arith.extui %10 : i1 to i32
    %c0_i32_9 = arith.constant 0 : i32
    %12 = arith.cmpi ne, %11, %c0_i32_9 : i32
    scf.if %12 {
      %c0_14 = arith.constant 0 : index
      %c0_15 = arith.constant 0 : index
      %19 = vector.load %arg8[%c0_14, %c0_15] : memref<8x128xf32, #tpu.memory_space<vmem>>, vector<8x128xf32>
      tpu.vector_store %arg8[%c0_14, %c0_15], %9 {strides = array<i32>} : memref<8x128xf32, #tpu.memory_space<vmem>>, vector<8x128xf32>,
    } else {
    }
    %c0_i32_10 = arith.constant 0 : i32
    %13 = arith.cmpi sgt, %arg1, %c0_i32_10 : i32
    %14 = arith.extui %13 : i1 to i32
    %c0_i32_11 = arith.constant 0 : i32
    %15 = arith.cmpi ne, %14, %c0_i32_11 : i32
    scf.if %15 {
      %c0_14 = arith.constant 0 : index
      %c0_15 = arith.constant 0 : index
      %19 = vector.load %arg8[%c0_14, %c0_15] : memref<8x128xf32, #tpu.memory_space<vmem>>, vector<8x128xf32>
      %20 = arith.addf %19, %9 : vector<8x128xf32>
      %c0_16 = arith.constant 0 : index
      %c0_17 = arith.constant 0 : index
      %21 = vector.load %arg8[%c0_16, %c0_17] : memref<8x128xf32, #tpu.memory_space<vmem>>, vector<8x128xf32>
      tpu.vector_store %arg8[%c0_16, %c0_17], %20 {strides = array<i32>} : memref<8x128xf32, #tpu.memory_space<vmem>>, vector<8x128xf32>,
    } else {
    }
    %c0_i32_12 = arith.constant 0 : i32
    %16 = arith.cmpi eq, %arg1, %c0_i32_12 : i32
    %17 = arith.extui %16 : i1 to i32
    %c0_i32_13 = arith.constant 0 : i32
    %18 = arith.cmpi ne, %17, %c0_i32_13 : i32
    scf.if %18 {
      %c0_14 = arith.constant 0 : index
      %c0_15 = arith.constant 0 : index
      %19 = vector.load %arg8[%c0_14, %c0_15] : memref<8x128xf32, #tpu.memory_space<vmem>>, vector<8x128xf32>
      %c0_16 = arith.constant 0 : index
      %c0_17 = arith.constant 0 : index
      %20 = vector.load %arg6[%c0_16, %c0_17] : memref<1x128xf32, #tpu.memory_space<vmem>>, vector<1x128xf32>
      %21 = vector.broadcast %20 : vector<1x128xf32> to vector<8x128xf32>
      %22 = arith.addf %19, %21 : vector<8x128xf32>
      %c0_18 = arith.constant 0 : index
      %c0_19 = arith.constant 0 : index
      %23 = vector.load %arg7[%c0_18, %c0_19] : memref<8x128xf32, #tpu.memory_space<vmem>>, vector<8x128xf32>
      tpu.vector_store %arg7[%c0_18, %c0_19], %22 {strides = array<i32>} : memref<8x128xf32, #tpu.memory_space<vmem>>, vector<8x128xf32>,
    } else {
    }
    return
  }
  func.func @transform_0(%arg0: i32, %arg1: i32) -> (i32, i32) {
    %c0_i32 = arith.constant 0 : i32
    %c0_i32_0 = arith.constant 0 : i32
    return %arg0, %c0_i32 : i32, i32
  }
  func.func @transform_1(%arg0: i32, %arg1: i32) -> (i32, i32) {
    %c0_i32 = arith.constant 0 : i32
    %c0_i32_0 = arith.constant 0 : i32
    return %c0_i32, %arg1 : i32, i32
  }
  func.func @transform_2(%arg0: i32, %arg1: i32) -> (i32, i32) {
    %c0_i32 = arith.constant 0 : i32
    %c0_i32_0 = arith.constant 0 : i32
    return %c0_i32, %arg1 : i32, i32
  }
  func.func @transform_3(%arg0: i32, %arg1: i32) -> (i32, i32) {
    %c0_i32 = arith.constant 0 : i32
    %c0_i32_0 = arith.constant 0 : i32
    return %arg1, %c0_i32 : i32, i32
  }
  func.func @transform_4(%arg0: i32, %arg1: i32) -> (i32, i32) {
    %c0_i32 = arith.constant 0 : i32
    %c0_i32_0 = arith.constant 0 : i32
    %c0_i32_1 = arith.constant 0 : i32
    return %c0_i32, %c0_i32_0 : i32, i32
  }
  func.func @transform_5(%arg0: i32, %arg1: i32) -> (i32, i32) {
    %c0_i32 = arith.constant 0 : i32
    %c0_i32_0 = arith.constant 0 : i32
    return %arg0, %c0_i32 : i32, i32
  }
}

</mosaic_0001>

<bundles_post_ra>
// kernel: feed_forward.1
= control target key start
LH: loop header
LB: loop body
LE: loop exit
PB: predicated region body
PF: predicated region fallthrough
CT: control target
= control target key end

     0   :  { %s795_s18 = smov 0   ;;  %s797_s19 = smov 0   ;;  %s975_s0 = inlined_call_operand.vmem [shape: f32[16,128], index: 0, kind: input, shape index: {}]   ;;  %s976_s1 = inlined_call_operand.vmem [shape: f32[128,128], index: 1, kind: input, shape index: {}]   ;;  %s977_s2 = inlined_call_operand.vmem [shape: f32[1,128], index: 2, kind: input, shape index: {}]   ;;  %s978_s3 = inlined_call_operand.vmem [shape: f32[128,128], index: 3, kind: input, shape index: {}]   ;;  %s979_s4 = inlined_call_operand.vmem [shape: f32[1,128], index: 4, kind: input, shape index: {}]   ;;  %s980_s5 = inlined_call_operand.vmem [shape: f32[16,128], index: 5, kind: output, shape index: {}]  }
   0x1   :  { %s799_s20 = smov 0  }
   0x2 LB: > { %s27_s21 = sadd.s32 1, %s757_s19  ;;  %p602_p0 = scmp.ge.s32.totalorder %s761_s20, 1  ;;  %s761_s20 = sphi %s799_s20, %s15_s20   ;;  %s757_s19 = sphi %s797_s19, %s982_s19   ;;  %s753_s18 = sphi %s795_s18, %s981_s18  }
   0x3   : > { %p29_p1 = scmp.ge.s32.totalorder %s27_s21, 2  ;;  %p226_p2 = scmp.lt.s32.totalorder %s761_s20, 3 }
   0x5   : > { %s984_s21 = smov (%p29_p1, %s27_s21), 0  ;;  %p227_p3 = pnand %p602_p0, %p226_p2 }
   0x6   : > { %p264_p4 = scmp.lt.s32.totalorder (!%p227_p3), %s753_s18, 1 }
   0x7   : > { %230 = sbr.rel (%p227_p3) target bundleno = 438 (0x1b6), region = 40 }
   0xc   : > { %v301_v0 = vld [vmem:[%s976_s1 + $0x78] sm:$0xff]  ;;  %v763_v1 = vmov 0.0   ;;  %v300_v2 = vld [vmem:[%s976_s1 + $0x70] sm:$0xff]  ;;  %vm764_vm0 = vmmov 0   ;;  %v299_v3 = vld [vmem:[%s976_s1 + $0x68] sm:$0xff]  ;;  %s986_s18 = smov (!%p264_p4, %s753_s18), 1 }
   0xd   : > { %643 = vmatprep.subr.mxu0 %v763_v1  ;;  %675 = vmatprep.mubr.msk.f32.mxu0 %vm764_vm0, %v763_v1  ;;  %v298_v4 = vld [vmem:[%s976_s1 + $0x60] sm:$0xff]  ;;  %v395_v5 = vld [vmem:[%s978_s3 + $0x78] sm:$0xff]  ;;  %v394_v6 = vld [vmem:[%s978_s3 + $0x70] sm:$0xff]  ;;  %s603_s28 = sshll.u32 %s986_s18, 3 }
   0xe   : > { %644 = vmatpush3.msra.mxu0 %v301_v0  ;;  %678 = vmatprep.subr.mxu1 %v763_v1  ;;  %v297_v7 = vld [vmem:[%s976_s1 + $0x58] sm:$0xff]  ;;  %v393_v8 = vld [vmem:[%s978_s3 + $0x68] sm:$0xff]  ;;  %v296_v9 = vld [vmem:[%s976_s1 + $0x50] sm:$0xff]  ;;  %s267_s12 = scalar_lea.vmem %s975_s0, %s603_s28  ;;  %s284_s9 = scalar_lea.vmem %s980_s5, %s603_s28 }
   0xf   : > { %645 = vmatprep.subr.mxu0 %v763_v1  ;;  %710 = vmatprep.mubr.msk.f32.mxu1 %vm764_vm0, %v763_v1  ;;  %v392_v10 = vld [vmem:[%s978_s3 + $0x60] sm:$0xff]  ;;  %v295_v11 = vld [vmem:[%s976_s1 + $0x48] sm:$0xff]  ;;  %v391_v12 = vld [vmem:[%s978_s3 + $0x58] sm:$0xff] }
  0x10   : > { %646 = vmatpush3.msra.mxu0 %v300_v2  ;;  %679 = vmatpush3.msra.mxu1 %v395_v5  ;;  %v294_v13 = vld [vmem:[%s976_s1 + $0x40] sm:$0xff]  ;;  %v390_v14 = vld [vmem:[%s978_s3 + $0x50] sm:$0xff]  ;;  %v293_v15 = vld [vmem:[%s976_s1 + $0x38] sm:$0xff] }
  0x11   : > { %647 = vmatprep.subr.mxu0 %v763_v1  ;;  %680 = vmatprep.subr.mxu1 %v763_v1  ;;  %v389_v16 = vld [vmem:[%s978_s3 + $0x48] sm:$0xff]  ;;  %v292_v17 = vld [vmem:[%s976_s1 + $0x30] sm:$0xff]  ;;  %v388_v18 = vld [vmem:[%s978_s3 + $0x40] sm:$0xff] }
  0x12   : > { %648 = vmatpush3.msra.mxu0 %v299_v3  ;;  %681 = vmatpush3.msra.mxu1 %v394_v6  ;;  %v291_v19 = vld [vmem:[%s976_s1 + $0x28] sm:$0xff]  ;;  %v387_v20 = vld [vmem:[%s978_s3 + $0x38] sm:$0xff]  ;;  %v290_v21 = vld [vmem:[%s976_s1 + $0x20] sm:$0xff] }
  0x13   : > { %649 = vmatprep.subr.mxu0 %v763_v1  ;;  %682 = vmatprep.subr.mxu1 %v763_v1  ;;  %v386_v22 = vld [vmem:[%s978_s3 + $0x30] sm:$0xff]  ;;  %v289_v23 = vld [vmem:[%s976_s1 + $0x18] sm:$0xff]  ;;  %v385_v24 = vld [vmem:[%s978_s3 + $0x28] sm:$0xff] }
  0x14   : > { %650 = vmatpush3.msra.mxu0 %v298_v4  ;;  %683 = vmatpush3.msra.mxu1 %v393_v8  ;;  %v288_v25 = vld [vmem:[%s976_s1 + $0x10] sm:$0xff]  ;;  %v384_v26 = vld [vmem:[%s978_s3 + $0x20] sm:$0xff]  ;;  %v287_v27 = vld [vmem:[%s976_s1 + $0x8] sm:$0xff] }
  0x15   : > { %651 = vmatprep.subr.mxu0 %v763_v1  ;;  %684 = vmatprep.subr.mxu1 %v763_v1  ;;  %v383_v28 = vld [vmem:[%s978_s3 + $0x18] sm:$0xff]  ;;  %v286_v29 = vld [vmem:[%s976_s1] sm:$0xff]  ;;  %v382_v31 = vld [vmem:[%s978_s3 + $0x10] sm:$0xff] }
  0x16   : > { %652 = vmatpush3.msra.mxu0 %v297_v7  ;;  %685 = vmatpush3.msra.mxu1 %v392_v10  ;;  %v285_v30 = vld [vmem:[%s267_s12] sm:$0xff]  ;;  %v381_v32 = vld [vmem:[%s978_s3 + $0x8] sm:$0xff] }
  0x17   : > { %653 = vmatprep.subr.mxu0 %v763_v1  ;;  %686 = vmatprep.subr.mxu1 %v763_v1  ;;  %v380_v33 = vld [vmem:[%s978_s3] sm:$0xff] }
  0x18   : > { %654 = vmatpush3.msra.mxu0 %v296_v9  ;;  %687 = vmatpush3.msra.mxu1 %v391_v12  ;;  %v605_v34 = vld [vmem:[%s977_s2] ss:$0 sm:$0xff] }
  0x19   : > { %655 = vmatprep.subr.mxu0 %v763_v1  ;;  %688 = vmatprep.subr.mxu1 %v763_v1  ;;  %v606_v39 = vld [vmem:[%s979_s4] ss:$0 sm:$0xff] }
  0x1a   : > { %656 = vmatpush3.msra.mxu0 %v295_v11  ;;  %689 = vmatpush3.msra.mxu1 %v390_v14 }
  0x1b   : > { %657 = vmatprep.subr.mxu0 %v763_v1  ;;  %690 = vmatprep.subr.mxu1 %v763_v1 }
  0x1c   : > { %658 = vmatpush3.msra.mxu0 %v294_v13  ;;  %691 = vmatpush3.msra.mxu1 %v389_v16 }
  0x1d   : > { %659 = vmatprep.subr.mxu0 %v763_v1  ;;  %692 = vmatprep.subr.mxu1 %v763_v1 }
  0x1e   : > { %660 = vmatpush3.msra.mxu0 %v293_v15  ;;  %693 = vmatpush3.msra.mxu1 %v388_v18 }
  0x1f   : > { %661 = vmatprep.subr.mxu0 %v763_v1  ;;  %694 = vmatprep.subr.mxu1 %v763_v1 }
  0x20   : > { %662 = vmatpush3.msra.mxu0 %v292_v17  ;;  %695 = vmatpush3.msra.mxu1 %v387_v20 }
  0x21   : > { %663 = vmatprep.subr.mxu0 %v763_v1  ;;  %696 = vmatprep.subr.mxu1 %v763_v1 }
  0x22   : > { %664 = vmatpush3.msra.mxu0 %v291_v19  ;;  %697 = vmatpush3.msra.mxu1 %v386_v22 }
  0x23   : > { %665 = vmatprep.subr.mxu0 %v763_v1  ;;  %698 = vmatprep.subr.mxu1 %v763_v1 }
  0x24   : > { %666 = vmatpush3.msra.mxu0 %v290_v21  ;;  %699 = vmatpush3.msra.mxu1 %v385_v24 }
  0x25   : > { %667 = vmatprep.subr.mxu0 %v763_v1  ;;  %700 = vmatprep.subr.mxu1 %v763_v1 }
  0x26   : > { %668 = vmatpush3.msra.mxu0 %v289_v23  ;;  %701 = vmatpush3.msra.mxu1 %v384_v26 }
  0x27   : > { %669 = vmatprep.subr.mxu0 %v763_v1  ;;  %702 = vmatprep.subr.mxu1 %v763_v1 }
  0x28   : > { %670 = vmatpush3.msra.mxu0 %v288_v25  ;;  %703 = vmatpush3.msra.mxu1 %v383_v28 }
  0x29   : > { %671 = vmatprep.subr.mxu0 %v763_v1  ;;  %704 = vmatprep.subr.mxu1 %v763_v1 }
  0x2a   : > { %672 = vmatpush3.msra.mxu0 %v287_v27  ;;  %705 = vmatpush3.msra.mxu1 %v382_v31 }
  0x2b   : > { %673 = vmatprep.subr.mxu0 %v763_v1  ;;  %706 = vmatprep.subr.mxu1 %v763_v1 }
  0x2c   : > { %674 = vmatpush3.msra.mxu0 %v286_v29  ;;  %707 = vmatpush3.msra.mxu1 %v381_v32 }
  0x2d   : > { %676 = vmatmul.mubr.f32.vlgmr.msra.gmra.mxu0 %v285_v30  ;;  %708 = vmatprep.subr.mxu1 %v763_v1 }
  0x2e   : > { %709 = vmatpush3.msra.mxu1 %v380_v33 }
  0xed   : > { %v375_v35 = vpop.f32.mrf.mxu0 }
  0xee   : > { %v376_v36 = vadd.f32 %v605_v34, %v375_v35 }
  0xef   : > { %v677_v37 = vpop.f32.mrf.mxu0 }
  0xf0   : > { %v379_v38 = vmax.f32 %v376_v36, 0.0 }
  0xf2   : > { %711 = vmatmul.mubr.f32.vlgmr.msra.gmra.mxu1 %v379_v38 }
 0x1b2   : > { %v462_v40 = vpop.f32.mrf.mxu1 }
 0x1b3   : > { %v489_v41 = vadd.f32 %v606_v39, %v462_v40 }
 0x1b4   : > { %v712_v42 = vpop.f32.mrf.mxu1 }
 0x1b5   : > { %490 = vst [vmem:[%s284_s9] sm:$0xff] %v489_v41 }
 0x1b6 PF: > { %s15_s20 = sadd.s32 1, %s761_s20   ;;  %s981_s18 = smov %s757_s19 }
 0x1b7   : > { %p12_p5 = scmp.ge.s32.totalorder %s15_s20, 4   ;;  %s982_s19 = smov %s984_s21 }
 0x1b9   :  { %14 = sbr.rel (!%p12_p5) target bundleno = 2 (0x2), region = 91 }

</bundles_post_ra>
